<compile_context>
chip_gen: v7x
topology: tpu7x:2x2x1
jax: 0.10.0
libtpu: 0.0.40
codegen_flags: <defaults>
</compile_context>

<pallas_src>
import functools

import jax
import jax.numpy as jnp
from jax import lax
from jax.experimental import pallas as pl
from jax.experimental.pallas import tpu as pltpu


def _focal_loss_kernel(x_ref, t_ref, out_ref, *, gamma: float, n_rows: int,
                       block_rows: int, chunk_rows: int, num_chunks: int,
                       num_classes: int):
    row0 = pl.program_id(0) * block_rows

    # Loop invariants, hoisted (JAX does not CSE broadcast_in_dim in loops).
    cls_iota = lax.broadcasted_iota(jnp.int32, (num_classes, chunk_rows), 0)
    lane_iota = lax.broadcasted_iota(jnp.int32, (1, chunk_rows), 1)

    def chunk_body(j, acc):
        start = pl.multiple_of(j * chunk_rows, chunk_rows)

        # (chunk_rows, C) slab; transpose so rows live on lanes: every per-row
        # quantity below is lane-dense (no lane-padded (rows, 1) temporaries).
        x = x_ref[pl.ds(start, chunk_rows), :].astype(jnp.float32)
        xt = x.T                                                   # (C, cr)
        t_row = t_ref[0, j]                                        # (cr,) int32

        # Numerically-stable log-softmax; only the target column is needed:
        #   logpt = x[target] - m - log(sum(exp(x - m)))
        m = jnp.max(xt, axis=0, keepdims=True)                     # (1, cr)
        z = xt - m                                                 # (C, cr)
        se = jnp.sum(jnp.exp(z), axis=0, keepdims=True)            # (1, cr)
        zt = jnp.sum(jnp.where(cls_iota == t_row, z, 0.0),
                     axis=0, keepdims=True)                        # (1, cr)
        logpt = zt - jnp.log(se)                                   # (1, cr) <=0

        # Focal weight, specialized on the static (compile-time) gamma.
        if gamma == 0.0:
            loss = -logpt
        else:
            q = jnp.maximum(1.0 - jnp.exp(logpt), 0.0)             # 1 - pt
            if float(gamma).is_integer() and 0 < int(gamma) <= 4:
                w = q
                for _ in range(int(gamma) - 1):
                    w = w * q
            else:
                # pow(q, gamma) = exp(gamma*log(q)); guard q == 0 (pt -> 1).
                safe_q = jnp.maximum(q, jnp.float32(1e-30))
                w = jnp.where(q > 0.0,
                              jnp.exp(jnp.float32(gamma) * jnp.log(safe_q)),
                              0.0)
            loss = -w * logpt                                      # (1, cr)

        # Mask rows beyond N (ragged last block / last chunk).  where() keeps
        # garbage (possibly NaN) rows from the truncated DMA out of the sum.
        valid = (row0 + start + lane_iota) < n_rows
        return acc + jnp.where(valid, loss, 0.0)

    acc = lax.fori_loop(0, num_chunks, chunk_body,
                        jnp.zeros((1, chunk_rows), jnp.float32))
    out_ref[0] = jnp.sum(acc, axis=1, keepdims=True)               # (1, 1)


def focal_loss(inputs: jax.Array, target: jax.Array, gamma: float = 0.0, *,
               block_rows: int | None = None, chunk_rows: int | None = None,
               pipeline_budget_bytes: int = 8 * 1024 * 1024) -> jax.Array:
    """Pallas TPU implementation of FocalLoss.forward.

    inputs: (N, C) float logits (any float dtype; cast to f32 inside kernel)
    target: (N,) or (N, 1) integer class indices (clamped to [0, C-1])
    returns: scalar float32 loss
    """
    n, c = inputs.shape
    itemsize = jnp.dtype(inputs.dtype).itemsize
    n_ceil8 = max(8, ((n + 7) // 8) * 8)

    # Rows per compute strip (the lane dimension after the in-kernel
    # transpose): a multiple of 128 when possible, bounded so per-strip
    # temporaries stay small.
    if chunk_rows is None:
        chunk_rows = max(8, ((32 * 1024) // max(c, 1)) // 8 * 8)
        if chunk_rows >= 128:
            chunk_rows = min(1024, (chunk_rows // 128) * 128)
    chunk_rows = max(8, (int(chunk_rows) // 8) * 8)
    chunk_rows = min(chunk_rows, n_ceil8)

    # Rows per DMA tile, from the double-buffered VMEM budget:
    #   2*(rows*C*itemsize) [logits] + 2*(rows*4) [lane-dense packed targets].
    if block_rows is None:
        per_row = 2 * c * itemsize + 2 * 4
        block_rows = pipeline_budget_bytes // max(per_row, 1)
        # keep a single logits buffer <= ~4 MiB (v7x-safe, already on roofline)
        block_rows = min(block_rows, (4 * 1024 * 1024) // max(c * itemsize, 1))
    block_rows = max(chunk_rows, (int(block_rows) // chunk_rows) * chunk_rows)
    block_rows = min(block_rows,
                     max(chunk_rows, (n_ceil8 // chunk_rows) * chunk_rows))

    cpb = block_rows // chunk_rows                 # chunks per block
    n_blocks = (n + block_rows - 1) // block_rows

    # Targets: clamp, pad only this tiny int32 vector, pack lane-dense.
    t_flat = jnp.clip(target.reshape(-1).astype(jnp.int32), 0, c - 1)
    pad = n_blocks * block_rows - n
    if pad:
        t_flat = jnp.pad(t_flat, (0, pad))
    t_packed = t_flat.reshape(n_blocks, cpb, chunk_rows)

    kernel = functools.partial(
        _focal_loss_kernel, gamma=float(gamma), n_rows=n,
        block_rows=block_rows, chunk_rows=chunk_rows, num_chunks=cpb,
        num_classes=c)

    # Scoped-VMEM limit from the actual footprint (+ headroom), capped well
    # below v7x's 64 MiB per TensorCore.
    def _rup(a, b):
        return (a + b - 1) // b * b
    logits_buf = block_rows * c * itemsize
    tgt_buf = _rup(cpb, 8) * _rup(chunk_rows, 128) * 4
    strip = _rup(c, 8) * _rup(chunk_rows, 128) * 4
    footprint = 2 * (logits_buf + tgt_buf) + 8 * strip
    vmem_limit = int(min(44 << 20, max(16 << 20, 2 * footprint)))

    cost = pl.CostEstimate(
        flops=6 * n * c,
        transcendentals=n * c + 3 * n,
        bytes_accessed=n * c * itemsize + n * 4 + n_blocks * 4,
    )

    partials = pl.pallas_call(
        kernel,
        out_shape=jax.ShapeDtypeStruct((n_blocks, 1, 1), jnp.float32),
        grid_spec=pltpu.PrefetchScalarGridSpec(
            num_scalar_prefetch=0,
            grid=(n_blocks,),
            in_specs=[
                pl.BlockSpec((block_rows, c), lambda i: (i, 0)),
                pl.BlockSpec((1, cpb, chunk_rows), lambda i: (i, 0, 0)),
            ],
            out_specs=pl.BlockSpec((1, 1, 1), lambda i: (i, 0, 0)),
        ),
        compiler_params=pltpu.CompilerParams(
            dimension_semantics=("parallel",),
            vmem_limit_bytes=vmem_limit,
        ),
        cost_estimate=cost,
    )(inputs, t_packed)

    return jnp.sum(partials) / jnp.float32(n)


def _focal_loss_ref(inputs, target, gamma):
    logp = jax.nn.log_softmax(inputs.astype(jnp.float32), axis=1)
    logpt = jnp.take_along_axis(
        logp, target.reshape(-1, 1).astype(jnp.int32), axis=1).reshape(-1)
    pt = jnp.exp(logpt)
    loss = -1.0 * jnp.power(1.0 - pt, jnp.float32(gamma)) * logpt
    return jnp.mean(loss)


if __name__ == "__main__":
    key = jax.random.PRNGKey(0)
    k1, k2, k3, k4, k5, k6 = jax.random.split(key, 6)

    ok = True

    # Small shape consistent with the module: batch of 8 samples, 32 classes.
    N, C = 8, 32
    x = jax.random.normal(k1, (N, C), dtype=jnp.float32)
    t = jax.random.randint(k2, (N,), 0, C, dtype=jnp.int32)
    for gamma in (0.0, 2.0, 0.5):
        out = jax.block_until_ready(focal_loss(x, t, gamma=gamma))
        ref = _focal_loss_ref(x, t, gamma)
        if not jnp.allclose(out, ref, rtol=1e-5, atol=1e-5):
            ok = False
            print(f"MISMATCH N={N} gamma={gamma}: pallas={out} ref={ref}")

    # Ragged multi-block grid: 3 blocks of 16 rows (last block truncated),
    # multi-chunk inner loop (chunk_rows=8), no logits padding anywhere.
    N2 = 40
    x2 = jax.random.normal(k3, (N2, C), dtype=jnp.float32)
    t2 = jax.random.randint(k4, (N2,), 0, C, dtype=jnp.int32)
    for gamma in (0.0, 2.0):
        out = jax.block_until_ready(
            focal_loss(x2, t2, gamma=gamma, block_rows=16, chunk_rows=8))
        ref = _focal_loss_ref(x2, t2, gamma)
        if not jnp.allclose(out, ref, rtol=1e-5, atol=1e-5):
            ok = False
            print(f"MISMATCH N={N2} gamma={gamma}: pallas={out} ref={ref}")

    # Larger ragged batch through the default (auto-sized) tiling path:
    # exercises multi-block grid + masked tail chunk + default VMEM budgeting.
    N3 = 2999
    x3 = jax.random.normal(k5, (N3, C), dtype=jnp.float32)
    t3 = jax.random.randint(k6, (N3,), 0, C, dtype=jnp.int32)
    out = jax.block_until_ready(focal_loss(x3, t3, gamma=2.0))
    ref = _focal_loss_ref(x3, t3, 2.0)
    if not jnp.allclose(out, ref, rtol=1e-5, atol=1e-5):
        ok = False
        print(f"MISMATCH N={N3} gamma=2.0: pallas={out} ref={ref}")

    if ok:
        print("KERNEL_OK")
</pallas_src>

<mosaic_0001>
module attributes {stable_mosaic.version = 11 : i64} {
  func.func @_focal_loss_kernel(%arg0: i32, %arg1: memref<8x32xf32, #tpu.memory_space<vmem>>, %arg2: memref<1x1x8xi32, #tpu.memory_space<vmem>>, %arg3: memref<1x1x1xf32, #tpu.memory_space<vmem>>) attributes {dimension_semantics = [#tpu.dimension_semantics<parallel>], iteration_bounds = array<i64: 1>, scalar_prefetch = 0 : i64, scratch_operands = 0 : i64, tpu.core_type = #tpu.core_type<tc>, window_params = [{transform_indices = @transform_0, window_bounds = array<i64: 8, 32>}, {transform_indices = @transform_1, window_bounds = array<i64: 1, 1, 8>}, {transform_indices = @transform_2, window_bounds = array<i64: 1, 1, 1>}]} {
    %c8_i32 = arith.constant 8 : i32
    %0 = arith.muli %arg0, %c8_i32 : i32
    %1 = tpu.iota {dimensions = array<i32: 0>} : vector<32x8xi32>
    %2 = tpu.iota {dimensions = array<i32: 1>} : vector<1x8xi32>
    %cst = arith.constant 0.000000e+00 : f32
    %3 = vector.broadcast %cst : f32 to vector<1x8xf32>
    %c0_i32 = arith.constant 0 : i32
    %c8_i32_0 = arith.constant 8 : i32
    %4 = arith.muli %c0_i32, %c8_i32_0 : i32
    %5 = tpu.assume_multiple %4, 8 : i32
    %6 = arith.index_cast %5 : i32 to index
    %c0 = arith.constant 0 : index
    %7 = vector.load %arg1[%6, %c0] : memref<8x32xf32, #tpu.memory_space<vmem>>, vector<8x32xf32>
    %8 = tpu.transpose %7, [1, 0] : vector<8x32xf32> -> vector<32x8xf32>
    %c0_1 = arith.constant 0 : index
    %9 = arith.index_cast %c0_i32 : i32 to index
    %c0_2 = arith.constant 0 : index
    %10 = vector.load %arg2[%c0_1, %9, %c0_2] : memref<1x1x8xi32, #tpu.memory_space<vmem>>, vector<1x1x8xi32>
    %11 = vector.shape_cast %10 : vector<1x1x8xi32> to vector<8xi32>
    %cst_3 = arith.constant dense<0xFF800000> : vector<8xf32>
    %12 = vector.multi_reduction <maximumf>, %8, %cst_3 [0] : vector<32x8xf32> to vector<8xf32>
    %13 = vector.shape_cast %12 : vector<8xf32> to vector<1x8xf32>
    %14 = vector.broadcast %13 : vector<1x8xf32> to vector<32x8xf32>
    %15 = arith.subf %8, %14 : vector<32x8xf32>
    %16 = math.exp %15 : vector<32x8xf32>
    %cst_4 = arith.constant dense<0.000000e+00> : vector<8xf32>
    %17 = vector.multi_reduction <add>, %16, %cst_4 [0] : vector<32x8xf32> to vector<8xf32>
    %18 = vector.shape_cast %17 : vector<8xf32> to vector<1x8xf32>
    %19 = vector.shape_cast %11 : vector<8xi32> to vector<1x8xi32>
    %20 = vector.broadcast %19 : vector<1x8xi32> to vector<32x8xi32>
    %21 = arith.cmpi eq, %1, %20 : vector<32x8xi32>
    %cst_5 = arith.constant 0.000000e+00 : f32
    %22 = vector.broadcast %cst_5 : f32 to vector<32x8xf32>
    %23 = arith.select %21, %15, %22 : vector<32x8xi1>, vector<32x8xf32>
    %cst_6 = arith.constant dense<0.000000e+00> : vector<8xf32>
    %24 = vector.multi_reduction <add>, %23, %cst_6 [0] : vector<32x8xf32> to vector<8xf32>
    %25 = vector.shape_cast %24 : vector<8xf32> to vector<1x8xf32>
    %26 = math.log %18 : vector<1x8xf32>
    %27 = arith.subf %25, %26 : vector<1x8xf32>
    %cst_7 = arith.constant 0.000000e+00 : f32
    %28 = vector.broadcast %cst_7 : f32 to vector<1x8xf32>
    %29 = arith.subf %28, %27 : vector<1x8xf32>
    %30 = arith.addi %0, %5 : i32
    %31 = vector.broadcast %30 : i32 to vector<1x8xi32>
    %32 = arith.addi %31, %2 : vector<1x8xi32>
    %c8_i32_8 = arith.constant 8 : i32
    %33 = vector.broadcast %c8_i32_8 : i32 to vector<1x8xi32>
    %34 = arith.cmpi slt, %32, %33 : vector<1x8xi32>
    %cst_9 = arith.constant 0.000000e+00 : f32
    %35 = vector.broadcast %cst_9 : f32 to vector<1x8xf32>
    %36 = arith.select %34, %29, %35 : vector<1x8xi1>, vector<1x8xf32>
    %37 = arith.addf %3, %36 : vector<1x8xf32>
    %c1_i32 = arith.constant 1 : i32
    %cst_10 = arith.constant dense<0.000000e+00> : vector<1xf32>
    %38 = vector.multi_reduction <add>, %37, %cst_10 [1] : vector<1x8xf32> to vector<1xf32>
    %39 = vector.shape_cast %38 : vector<1xf32> to vector<1x1xf32>
    %c0_11 = arith.constant 0 : index
    %c0_12 = arith.constant 0 : index
    %c0_13 = arith.constant 0 : index
    %40 = vector.load %arg3[%c0_11, %c0_12, %c0_13] : memref<1x1x1xf32, #tpu.memory_space<vmem>>, vector<1x1x1xf32>
    %41 = vector.shape_cast %40 : vector<1x1x1xf32> to vector<1x1xf32>
    %42 = vector.shape_cast %39 : vector<1x1xf32> to vector<1x1x1xf32>
    tpu.vector_store %arg3[%c0_11, %c0_12, %c0_13], %42 {strides = array<i32>} : memref<1x1x1xf32, #tpu.memory_space<vmem>>, vector<1x1x1xf32>,
    return
  }
  func.func @transform_0(%arg0: i32) -> (i32, i32) {
    %c0_i32 = arith.constant 0 : i32
    %c0_i32_0 = arith.constant 0 : i32
    return %arg0, %c0_i32 : i32, i32
  }
  func.func @transform_1(%arg0: i32) -> (i32, i32, i32) {
    %c0_i32 = arith.constant 0 : i32
    %c0_i32_0 = arith.constant 0 : i32
    %c0_i32_1 = arith.constant 0 : i32
    return %arg0, %c0_i32, %c0_i32_0 : i32, i32, i32
  }
  func.func @transform_2(%arg0: i32) -> (i32, i32, i32) {
    %c0_i32 = arith.constant 0 : i32
    %c0_i32_0 = arith.constant 0 : i32
    %c0_i32_1 = arith.constant 0 : i32
    return %arg0, %c0_i32, %c0_i32_0 : i32, i32, i32
  }
}

</mosaic_0001>

<bundles_post_ra>
// kernel: tpu_custom_call.1
= control target key start
LH: loop header
LB: loop body
LE: loop exit
PB: predicated region body
PF: predicated region fallthrough
CT: control target
= control target key end

     0   :  { %7 = vsyncpa [#allocation3], 0  ;;  %s279_s0 = inlined_call_operand.hbm [shape: f32[8,32], index: 0, kind: input, shape index: {}]   ;;  %s280_s1 = inlined_call_operand.vmem [shape: s32[1,1,8], index: 1, kind: input, shape index: {}]   ;;  %s281_s2 = inlined_call_operand.hbm [shape: f32[1,1,1], index: 2, kind: output, shape index: {}]  }
   0x1   :  { %8 = vsyncpa [#allocation4], 0  ;;  %s222_s9 = smov [#allocation2]   ;;  %s174_s13 = scalar_lea.hbm %s279_s0, 128 }
   0x2   :  { %s15_s10 = sshll.u32 %s222_s9, 4  ;;  %p175_p0 = scmp.ne.s32.totalorder %s279_s0, %s174_s13  ;;  %s16_s10 = int_to_ptr.vmem [resolvable:$true] %s15_s10 }
   0x3   :  { %p178_p1 = scmp.lt.u32.totalorder %s174_s13, %s279_s0 }
   0x5   :  { %p180_p2 = pnand %p178_p1, %p175_p0 }
   0x7   :  { %183 = shalt.err (!%p180_p2)
}
   0x8   :  { %s184_s18 = scalar_lea.vmem %s16_s10, 128  ;;  %p189_p4 = scmp.lt.s32.totalorder %s16_s10, %s16_s10 }
   0x9   :  { %p185_p3 = scmp.ne.s32.totalorder %s16_s10, %s184_s18  ;;  %p190_p5 = scmp.lt.s32.totalorder %s184_s18, %s184_s18 }
   0xb   :  { %p191_p6 = por %p190_p5, %p189_p4 }
   0xd   :  { %p192_p7 = pnand %p191_p6, %p185_p3 }
   0xf   :  { %195 = shalt.err (!%p192_p7)
}
  0x10   :  { %18 = dma.hbm_to_vmem [thread:$0]  %s279_s0, 128, %s16_s10, [#allocation3]  }
  0x11   :  { %218 = dma.done.wait [#allocation3], 128  }
  0x12   :  { %219 = vsyncadd [#allocation3], 4294967168  ;;  %v32_v0 = vld [vmem:[#allocation2] sm:$0xff]  ;;  %vm66_vm0 = vcmask 64512   ;;  %v25_v15 = vlaneseq  ;;  %vm143_vm6 = vcmask 0  }
  0x13   :  { %33 = vxpose.xlu0.b32.start.end [1/1] (short) (narrow) %v32_v0, 32  ;;  %v160_v25 = vld [vmem:[%s280_s1] ss:$0 sm:$0xff]  ;;  %s223_s1 = smov [#allocation5]  }
  0x14   :  { %v26_v18 = vshrl.u32 %v25_v15, 7  ;;  %s151_s22 = sshll.u32 %s223_s1, 4  ;;  %s152_s22 = int_to_ptr.vmem [resolvable:$true] %s151_s22 }
  0x15   :  { %s196_s23 = scalar_lea.vmem %s152_s22, 16  ;;  %s200_s24 = scalar_lea.vmem %s152_s22, 32 }
  0x16   :  { %v27_v24 = vadd.s32 8, %v26_v18  ;;  %vm109_vm1 = vcmp.eq.s32.totalorder %v26_v18, %v160_v25  ;;  %v28_v30 = vadd.s32 16, %v26_v18  ;;  %v29_v33 = vadd.s32 24, %v26_v18  ;;  %p197_p8 = scmp.ne.s32.totalorder %s152_s22, %s196_s23  ;;  %p201_p9 = scmp.lt.s32.totalorder %s152_s22, %s152_s22 }
  0x17   :  { %p202_p10 = scmp.lt.s32.totalorder %s200_s24, %s196_s23 }
  0x18   :  { %vm110_vm2 = vcmp.eq.s32.totalorder %v27_v24, %v160_v25  ;;  %vm111_vm3 = vcmp.eq.s32.totalorder %v28_v30, %v160_v25  ;;  %vm112_vm4 = vcmp.eq.s32.totalorder %v29_v33, %v160_v25 }
  0x19   :  { %p203_p11 = por %p202_p10, %p201_p9 }
  0x1b   :  { %p204_p12 = pnand %p203_p11, %p197_p8 }
  0x93   :  { %v49_v1 = vpop.trf.xlu0 }
  0x94   :  { %v67_v6 = vsel %vm66_vm0, %v49_v1, -inf }
  0x97   :  { %v50_v2 = vpop.trf.xlu0 }
  0x98   :  { %v68_v4 = vsel %vm66_vm0, %v50_v2, -inf }
  0x99   :  { %v71_v9 = vmax.f32 %v67_v6, %v68_v4 }
  0x9b   :  { %v51_v3 = vpop.trf.xlu0 }
  0x9c   :  { %v69_v7 = vsel %vm66_vm0, %v51_v3, -inf }
  0x9f   :  { %v52_v5 = vpop.trf.xlu0 }
  0xa0   :  { %v70_v8 = vsel %vm66_vm0, %v52_v5, -inf }
  0xa1   :  { %v72_v10 = vmax.f32 %v69_v7, %v70_v8 }
  0xa3   :  { %v73_v11 = vmax.f32 %v71_v9, %v72_v10 }
  0xa5   :  { %v74_v12 = vrot.slane %v73_v11, 4 }
  0xa7   :  { %v75_v13 = vmax.f32 %v73_v11, %v74_v12 }
  0xa9   :  { %v76_v14 = vrot.slane %v75_v13, 2 }
  0xab   :  { %v77_v16 = vmax.f32 %v75_v13, %v76_v14 }
  0xad   :  { %v78_v17 = vrot.slane %v77_v16, 1 }
  0xaf   :  { %v79_v19 = vmax.f32 %v77_v16, %v78_v17 }
  0xb1   :  { %v80_v20 = vsub.f32 %v49_v1, %v79_v19  ;;  %v81_v21 = vsub.f32 %v50_v2, %v79_v19  ;;  %v82_v22 = vsub.f32 %v51_v3, %v79_v19  ;;  %v83_v23 = vsub.f32 %v52_v5, %v79_v19 }
  0xb2   :  { %v31_v2 = vand.u32 127, %v25_v15 }
  0xb3   :  { %v84_v26 = vmul.f32 1.442695, %v80_v20  ;;  %v86_v27 = vmul.f32 1.442695, %v81_v21  ;;  %v88_v28 = vmul.f32 1.442695, %v82_v22 }
  0xb4   :  { %v90_v29 = vmul.f32 1.442695, %v83_v23  ;;  %v113_v31 = vsel %vm109_vm1, %v80_v20, 0.0  ;;  %v114_v32 = vsel %vm110_vm2, %v81_v21, 0.0  ;;  %v115_v37 = vsel %vm111_vm3, %v82_v22, 0.0 }
  0xb5   :  { %164 = vpow2.f32 %v84_v26  ;;  %v117_v34 = vsel %vm66_vm0, %v113_v31, 0.0  ;;  %v118_v35 = vsel %vm66_vm0, %v114_v32, 0.0  ;;  %v120_v44 = vsel %vm66_vm0, %v115_v37, 0.0 }
  0xb6   :  { %166 = vpow2.f32 %v86_v27  ;;  %v119_v38 = vadd.f32 %v118_v35, %v117_v34  ;;  %v116_v46 = vsel %vm112_vm4, %v83_v23, 0.0  ;;  %vm137_vm5 = vcmp.lt.s32.totalorder %v31_v2, 8 }
  0xb7   :  { %168 = vpow2.f32 %v88_v28  ;;  %v122_v51 = vsel %vm66_vm0, %v116_v46, 0.0 }
  0xb8   :  { %170 = vpow2.f32 %v90_v29  ;;  %v121_v47 = vadd.f32 %v120_v44, %v119_v38 }
  0xba   :  { %v123_v53 = vadd.f32 %v122_v51, %v121_v47 }
  0xbc   :  { %v124_v56 = vrot.slane %v123_v53, 4 }
  0xbe   :  { %v125_v59 = vadd.f32 %v124_v56, %v123_v53 }
  0xbf   :  { %v165_v36 = vpop.eup %164 }
  0xc0   :  { %v167_v39 = vpop.eup %166  ;;  %v92_v40 = vsel %vm66_vm0, %v165_v36, 0.0  ;;  %v126_v62 = vrot.slane %v125_v59, 2 }
  0xc1   :  { %v169_v41 = vpop.eup %168  ;;  %v93_v42 = vsel %vm66_vm0, %v167_v39, 0.0 }
  0xc2   :  { %v171_v43 = vpop.eup %170  ;;  %v94_v45 = vadd.f32 %v93_v42, %v92_v40  ;;  %v95_v48 = vsel %vm66_vm0, %v169_v41, 0.0  ;;  %v127_v63 = vadd.f32 %v126_v62, %v125_v59 }
  0xc3   :  { %v97_v50 = vsel %vm66_vm0, %v171_v43, 0.0 }
  0xc4   :  { %v96_v49 = vadd.f32 %v95_v48, %v94_v45  ;;  %v128_v0 = vrot.slane %v127_v63, 1 }
  0xc6   :  { %v98_v52 = vadd.f32 %v97_v50, %v96_v49  ;;  %v129_v3 = vadd.f32 %v128_v0, %v127_v63 }
  0xc8   :  { %v99_v54 = vrot.slane %v98_v52, 4 }
  0xca   :  { %v100_v55 = vadd.f32 %v99_v54, %v98_v52 }
  0xcc   :  { %v101_v57 = vrot.slane %v100_v55, 2 }
  0xce   :  { %v102_v58 = vadd.f32 %v101_v57, %v100_v55 }
  0xd0   :  { %v103_v60 = vrot.slane %v102_v58, 1 }
  0xd2   :  { %v104_v61 = vadd.f32 %v103_v60, %v102_v58 }
  0xd4   :  { %172 = vlog2.f32 %v104_v61 }
  0xde   :  { %v173_v1 = vpop.eup %172 }
  0xdf   :  { %v131_v4 = vmul.f32 0.6931472, %v173_v1 }
  0xe1   :  { %v132_v5 = vsub.f32 %v129_v3, %v131_v4 }
  0xe3   :  { %v133_v6 = vsub.f32 0.0, %v132_v5 }
  0xe5   :  { %v138_v7 = vsel %vm137_vm5, %v133_v6, 0.0 }
  0xe6   :  { %v140_v8 = vsel %vm66_vm0, %v138_v7, 0.0 }
  0xe7   :  { %141 = vadd.xlane.f32.xlu0 %v140_v8 }
 0x174   :  { %v142_v9 = vpop.xlane.xlu0 %141 }
 0x175   :  { %144 = vst.msk [vmem:[#allocation5] sm:$0x1] %vm143_vm6, %v142_v9 }
 0x176   :  { %207 = shalt.err (!%p204_p12)
}
 0x177   :  { %s208_s27 = scalar_lea.hbm %s281_s2, 16 }
 0x178   :  { %p209_p13 = scmp.ne.s32.totalorder %s281_s2, %s208_s27  ;;  %p212_p0 = scmp.lt.u32.totalorder %s208_s27, %s281_s2 }
 0x17a   :  { %p214_p1 = pnand %p212_p0, %p209_p13 }
 0x17c   :  { %217 = shalt.err (!%p214_p1)
}
 0x17d   :  { %154 = dma.vmem_to_hbm [thread:$0]  %s152_s22, 16, %s281_s2, [#allocation4]  }
 0x17e   :  { %220 = dma.done.wait [#allocation4], 16  }
 0x17f   :  { %221 = vsyncadd [#allocation4], 4294967280 }
 0x180   :  { %158 = vsyncpa [#allocation3], 1 }
 0x181   :  { %159 = vsyncpa [#allocation4], 1 }

</bundles_post_ra>
